<compile_context>
chip_gen: v6e
topology: v6e:2x2x1
jax: 0.10.0
libtpu: 0.0.40
codegen_flags: <defaults>
</compile_context>

<pallas_src>
import jax
import jax.numpy as jnp
from jax.experimental import pallas as pl
from jax.experimental.pallas import tpu as pltpu


def _icl_attn_kernel(xs_ref, ys_ref, wqk_ref, out_ref):
    # xs_ref : (TB, N, D)   bf16 — batch tile of inputs
    # ys_ref : (TB, 1, N)   f32  — labels, lane-dense along the key axis
    # wqk_ref: (D, 2*Hp)    bf16 — [Wq/sqrt(H) | Wk], each half padded to a
    #                              128-lane boundary (tile-aligned split)
    # out_ref: (TB, 1, N)   f32  — lane-dense predictions
    tb, n, d = xs_ref.shape
    hp = wqk_ref.shape[-1] // 2

    x = xs_ref[...]
    y = ys_ref[...]
    wqk = wqk_ref[...]

    # Fused q/k projection: one MXU pass, bf16 operands, f32 accumulation.
    qk = jnp.dot(x.reshape(tb * n, d), wqk,
                 preferred_element_type=jnp.float32).reshape(tb, n, 2 * hp)

    # 128-lane-aligned split (no in-tile lane selects). 1/sqrt(H) is already
    # folded into the Wq half; padded lanes are exactly zero on both sides so
    # they contribute nothing to the contraction.
    q = qk[:, :, :hp].astype(jnp.bfloat16)
    k = qk[:, :, hp:].astype(jnp.bfloat16)

    # Batched scores, contracting Hp directly (no explicit k transpose).
    scores = jnp.einsum('bnh,bmh->bnm', q, k,
                        preferred_element_type=jnp.float32)        # (TB, N, N)

    # Row-wise softmax in f32; normalization applied after the reduction so the
    # normalized attention matrix is never materialized. Exact divide (no
    # approx reciprocal) — this output may feed second-order analysis.
    m = jnp.max(scores, axis=-1, keepdims=True)
    p = jnp.exp(scores - m)                                        # (TB, N, N)
    denom = jnp.sum(p, axis=-1)                                    # (TB, N)
    num = jnp.sum(p * y, axis=-1)                                  # (TB, N)
    pred = num / denom                                             # (TB, N)
    out_ref[...] = pred.reshape(tb, 1, n).astype(out_ref.dtype)


def prepare_wqk(wq, wk, *, lane_align=128):
    """Build the fused projection weight ONCE (outside the per-call path).

    Folds 1/sqrt(H) into the Wq half, casts to bf16 for the MXU, and pads each
    half up to a 128-lane boundary so the in-kernel q/k split is tile-aligned.
    Returns a (D, 2*Hp) bf16 array.
    """
    d, h = wq.shape
    hp = ((h + lane_align - 1) // lane_align) * lane_align
    scale = 1.0 / jnp.sqrt(jnp.float32(h))
    wq_s = (wq * scale).astype(jnp.bfloat16)          # scale in f32, then cast
    wk_b = wk.astype(jnp.bfloat16)
    pad = [(0, 0), (0, hp - h)]
    return jnp.concatenate([jnp.pad(wq_s, pad), jnp.pad(wk_b, pad)], axis=-1)


def _default_batch_tile(b):
    # Aim for >=2 grid steps (v7x megacore sharding + DMA/compute overlap)
    # while keeping the tile a divisor of the batch.
    for steps in (8, 4, 2):
        if b % steps == 0:
            return b // steps
    return b


def model_wrapper_forward(inputs, wqk, *, batch_tile=None):
    """Pallas equivalent of ModelWrapper.forward: model(inputs[0], inputs[1]).

    `wqk` is the fused/padded weight from prepare_wqk (hoisted out of the
    per-call path — this forward is called repeatedly in Hessian analysis).
    """
    xs, ys = inputs[0], inputs[1]
    B, N, D = xs.shape
    two_hp = wqk.shape[-1]

    # Lane-dense ys layout: (B, 1, N) so the key/sequence axis is on the lanes.
    ys_t = jnp.swapaxes(ys, 1, 2) if ys.ndim == 3 else ys[:, None, :]
    ys_t = ys_t.astype(jnp.float32)

    # bf16 MXU operands: halves xs DMA bytes and runs the matmuls at bf16 rate.
    xs_b = xs.astype(jnp.bfloat16)

    TB = _default_batch_tile(B) if batch_tile is None else min(batch_tile, B)
    assert B % TB == 0, "batch must be divisible by the batch tile"
    grid = (B // TB,)

    cost = pl.CostEstimate(
        flops=2 * B * N * D * two_hp            # fused q/k projection
        + 2 * B * N * N * (two_hp // 2)         # scores
        + 5 * B * N * N,                        # softmax tail (VPU)
        transcendentals=B * N * N,              # exp
        bytes_accessed=xs_b.size * 2 + ys_t.size * 4 + wqk.size * 2 + B * N * 4,
    )

    out = pl.pallas_call(
        _icl_attn_kernel,
        out_shape=jax.ShapeDtypeStruct((B, 1, N), jnp.float32),
        grid_spec=pltpu.PrefetchScalarGridSpec(
            num_scalar_prefetch=0,
            grid=grid,
            in_specs=[
                pl.BlockSpec((TB, N, D), lambda b: (b, 0, 0)),
                pl.BlockSpec((TB, 1, N), lambda b: (b, 0, 0)),
                # Weight block is grid-invariant; Pallas keeps it resident.
                pl.BlockSpec((D, two_hp), lambda b: (0, 0)),
            ],
            out_specs=pl.BlockSpec((TB, 1, N), lambda b: (b, 0, 0)),
        ),
        compiler_params=pltpu.CompilerParams(
            dimension_semantics=("parallel",),        # shard batch across TCs
            vmem_limit_bytes=32 * 1024 * 1024,        # explicit; re-derive for
        ),                                            # large N on v7x (64 MiB)
        cost_estimate=cost,
    )(xs_b, ys_t, wqk)

    # Restore the (B, N, 1) shape the wrapped model returns.
    return jnp.swapaxes(out, 1, 2)


def _reference(inputs, wq, wk):
    """Pure-JAX reference with the same MXU precision policy as the kernel
    (bf16 matmul operands, f32 accumulation, f32 softmax)."""
    xs, ys = inputs[0], inputs[1]
    if ys.ndim == 2:
        ys = ys[..., None]
    h = wq.shape[-1]
    scale = 1.0 / jnp.sqrt(jnp.float32(h))
    xb = xs.astype(jnp.bfloat16)
    wq_s = (wq * scale).astype(jnp.bfloat16)
    wk_b = wk.astype(jnp.bfloat16)
    q = jnp.einsum("bnd,dh->bnh", xb, wq_s, preferred_element_type=jnp.float32)
    k = jnp.einsum("bnd,dh->bnh", xb, wk_b, preferred_element_type=jnp.float32)
    scores = jnp.einsum("bnh,bmh->bnm", q.astype(jnp.bfloat16),
                        k.astype(jnp.bfloat16),
                        preferred_element_type=jnp.float32)
    attn = jax.nn.softmax(scores, axis=-1)
    return jnp.einsum("bnm,bmo->bno", attn, ys.astype(jnp.float32))


if __name__ == "__main__":
    B, N, D, H = 2, 8, 16, 32

    key = jax.random.PRNGKey(0)
    k_xs, k_ys, k_wq, k_wk = jax.random.split(key, 4)

    xs = jax.random.normal(k_xs, (B, N, D), dtype=jnp.float32)
    ys = jax.random.normal(k_ys, (B, N, 1), dtype=jnp.float32)
    # deterministic synthetic parameters for the wrapped model
    wq = jax.random.normal(k_wq, (D, H), dtype=jnp.float32) / jnp.sqrt(jnp.float32(D))
    wk = jax.random.normal(k_wk, (D, H), dtype=jnp.float32) / jnp.sqrt(jnp.float32(D))

    inputs = (xs, ys)   # ModelWrapper.forward receives a tuple/list of two tensors

    # Fused/scaled/padded weight built once, outside the per-call path.
    wqk = prepare_wqk(wq, wk)

    out = model_wrapper_forward(inputs, wqk)
    out = jax.block_until_ready(out)

    ref = _reference(inputs, wq, wk)
    assert out.shape == (B, N, 1)
    assert jnp.allclose(out, ref, atol=2e-3, rtol=2e-3), float(jnp.max(jnp.abs(out - ref)))

    print("KERNEL_OK")
</pallas_src>

<mosaic_0001>
module attributes {stable_mosaic.version = 11 : i64} {
  func.func @_icl_attn_kernel(%arg0: i32, %arg1: memref<1x8x16xbf16, #tpu.memory_space<vmem>>, %arg2: memref<1x1x8xf32, #tpu.memory_space<vmem>>, %arg3: memref<16x256xbf16, #tpu.memory_space<vmem>>, %arg4: memref<1x1x8xf32, #tpu.memory_space<vmem>>) attributes {dimension_semantics = [#tpu.dimension_semantics<parallel>], iteration_bounds = array<i64: 2>, scalar_prefetch = 0 : i64, scratch_operands = 0 : i64, tpu.core_type = #tpu.core_type<tc>, window_params = [{transform_indices = @transform_0, window_bounds = array<i64: 1, 8, 16>}, {transform_indices = @transform_1, window_bounds = array<i64: 1, 1, 8>}, {pipeline_mode = #tpu.pipeline_mode<synchronous>, transform_indices = @transform_2, window_bounds = array<i64: 16, 256>}, {transform_indices = @transform_3, window_bounds = array<i64: 1, 1, 8>}]} {
    %c0 = arith.constant 0 : index
    %c0_0 = arith.constant 0 : index
    %c0_1 = arith.constant 0 : index
    %0 = vector.load %arg1[%c0, %c0_0, %c0_1] : memref<1x8x16xbf16, #tpu.memory_space<vmem>>, vector<1x8x16xbf16>
    %c0_2 = arith.constant 0 : index
    %c0_3 = arith.constant 0 : index
    %c0_4 = arith.constant 0 : index
    %1 = vector.load %arg2[%c0_2, %c0_3, %c0_4] : memref<1x1x8xf32, #tpu.memory_space<vmem>>, vector<1x1x8xf32>
    %c0_5 = arith.constant 0 : index
    %c0_6 = arith.constant 0 : index
    %2 = vector.load %arg3[%c0_5, %c0_6] : memref<16x256xbf16, #tpu.memory_space<vmem>>, vector<16x256xbf16>
    %3 = vector.shape_cast %0 : vector<1x8x16xbf16> to vector<8x16xbf16>
    %cst = arith.constant dense<0.000000e+00> : vector<8x256xf32>
    %4 = tpu.matmul %3, %2, %cst {dimension_numbers = #tpu.dot_dimension_numbers<[1], [0], [0], [1], [0, 0, 1, 1], [], []>} : vector<8x16xbf16>, vector<16x256xbf16>, vector<8x256xf32> -> vector<8x256xf32>
    %5 = vector.shape_cast %4 : vector<8x256xf32> to vector<1x8x256xf32>
    %6 = vector.extract_strided_slice %5 {offsets = [0, 0, 0], sizes = [1, 8, 128], strides = [1, 1, 1]} : vector<1x8x256xf32> to vector<1x8x128xf32>
    %7 = arith.truncf %6 : vector<1x8x128xf32> to vector<1x8x128xbf16>
    %8 = vector.extract_strided_slice %5 {offsets = [0, 0, 128], sizes = [1, 8, 128], strides = [1, 1, 1]} : vector<1x8x256xf32> to vector<1x8x128xf32>
    %9 = arith.truncf %8 : vector<1x8x128xf32> to vector<1x8x128xbf16>
    "tpu.trace_start"() <{level = 10 : i32, message = "bnh,bmh->bnm"}> : () -> ()
    %cst_7 = arith.constant dense<0.000000e+00> : vector<1x8x8xf32>
    %10 = tpu.matmul %7, %9, %cst_7 {dimension_numbers = #tpu.dot_dimension_numbers<[2], [2], [1], [1], [0, 0, 0, 1, 1, 1], [0], [0]>} : vector<1x8x128xbf16>, vector<1x8x128xbf16>, vector<1x8x8xf32> -> vector<1x8x8xf32>
    "tpu.trace_stop"() : () -> ()
    %cst_8 = arith.constant dense<0xFF800000> : vector<1x8xf32>
    %11 = vector.multi_reduction <maximumf>, %10, %cst_8 [2] : vector<1x8x8xf32> to vector<1x8xf32>
    %12 = vector.shape_cast %11 : vector<1x8xf32> to vector<1x8x1xf32>
    %13 = vector.broadcast %12 : vector<1x8x1xf32> to vector<1x8x8xf32>
    %14 = arith.subf %10, %13 : vector<1x8x8xf32>
    %15 = math.exp %14 : vector<1x8x8xf32>
    %cst_9 = arith.constant dense<0.000000e+00> : vector<1x8xf32>
    %16 = vector.multi_reduction <add>, %15, %cst_9 [2] : vector<1x8x8xf32> to vector<1x8xf32>
    %17 = vector.broadcast %1 : vector<1x1x8xf32> to vector<1x8x8xf32>
    %18 = arith.mulf %15, %17 : vector<1x8x8xf32>
    %cst_10 = arith.constant dense<0.000000e+00> : vector<1x8xf32>
    %19 = vector.multi_reduction <add>, %18, %cst_10 [2] : vector<1x8x8xf32> to vector<1x8xf32>
    %20 = arith.divf %19, %16 : vector<1x8xf32>
    %21 = vector.shape_cast %20 : vector<1x8xf32> to vector<1x1x8xf32>
    %c0_11 = arith.constant 0 : index
    %c0_12 = arith.constant 0 : index
    %c0_13 = arith.constant 0 : index
    %22 = vector.load %arg4[%c0_11, %c0_12, %c0_13] : memref<1x1x8xf32, #tpu.memory_space<vmem>>, vector<1x1x8xf32>
    tpu.vector_store %arg4[%c0_11, %c0_12, %c0_13], %21 {strides = array<i32>} : memref<1x1x8xf32, #tpu.memory_space<vmem>>, vector<1x1x8xf32>,
    return
  }
  func.func @transform_0(%arg0: i32) -> (i32, i32, i32) {
    %c0_i32 = arith.constant 0 : i32
    %c0_i32_0 = arith.constant 0 : i32
    %c0_i32_1 = arith.constant 0 : i32
    return %arg0, %c0_i32, %c0_i32_0 : i32, i32, i32
  }
  func.func @transform_1(%arg0: i32) -> (i32, i32, i32) {
    %c0_i32 = arith.constant 0 : i32
    %c0_i32_0 = arith.constant 0 : i32
    %c0_i32_1 = arith.constant 0 : i32
    return %arg0, %c0_i32, %c0_i32_0 : i32, i32, i32
  }
  func.func @transform_2(%arg0: i32) -> (i32, i32) {
    %c0_i32 = arith.constant 0 : i32
    %c0_i32_0 = arith.constant 0 : i32
    %c0_i32_1 = arith.constant 0 : i32
    return %c0_i32, %c0_i32_0 : i32, i32
  }
  func.func @transform_3(%arg0: i32) -> (i32, i32, i32) {
    %c0_i32 = arith.constant 0 : i32
    %c0_i32_0 = arith.constant 0 : i32
    %c0_i32_1 = arith.constant 0 : i32
    return %arg0, %c0_i32, %c0_i32_0 : i32, i32, i32
  }
}

</mosaic_0001>

<bundles_post_ra>
// kernel: tpu_custom_call.1
= control target key start
LH: loop header
LB: loop body
LE: loop exit
PB: predicated region body
PF: predicated region fallthrough
CT: control target
= control target key end

     0   :  { %8 = vsyncpa [#allocation3], 0  ;;  %s963_s0 = inlined_call_operand.hbm [shape: bf16[2,8,16], index: 0, kind: input, shape index: {}]   ;;  %s964_s1 = inlined_call_operand.hbm [shape: f32[2,1,8], index: 1, kind: input, shape index: {}]   ;;  %s965_s2 = inlined_call_operand.hbm [shape: bf16[16,256], index: 2, kind: input, shape index: {}]   ;;  %s966_s3 = inlined_call_operand.hbm [shape: f32[2,1,8], index: 3, kind: output, shape index: {}]  }
   0x1   :  { %10 = vsyncpa [#allocation3 + $0x1], 0 }
   0x2   :  { %11 = vsyncpa [#allocation6], 0 }
   0x3   :  { %13 = vsyncpa [#allocation6 + $0x1], 0 }
   0x4   :  { %14 = vsyncpa [#allocation4], 0 }
   0x5   :  { %16 = vsyncpa [#allocation4 + $0x1], 0  ;;  %s759_s12 = smov 0   ;;  %s761_s13 = smov 0  }
   0x6   :  { %s763_s14 = smov 0   ;;  %s765_s15 = smov 0  }
   0x7 LB: > { %s780_s16 = sadd.s32 4294967295, %s728_s15   ;;  %s475_s17 = sadd.s32 4294967294, %s728_s15   ;;  %s728_s15 = sphi %s765_s15, %s988_s15   ;;  %s724_s14 = sphi %s763_s14, %s987_s14   ;;  %s720_s13 = sphi %s761_s13, %s986_s13   ;;  %s716_s12 = sphi %s759_s12, %s985_s12  }
   0x8   : > { %p42_p0 = scmp.ne.s32.totalorder %s720_s13, %s716_s12  ;;  %p967_p1 = scmp.eq.s32.totalorder %s780_s16, 0 }
   0x9   : > { %p119_p3 = scmp.eq.s32.totalorder %s475_s17, 1  ;;  %p476_p5 = scmp.ge.s32.totalorder %s728_s15, 1 }
   0xa   : > { %p789_p4 = por %p967_p1, %p42_p0  ;;  %p126_p7 = scmp.lt.s32.totalorder %s728_s15, 3 }
   0xb   : > { %p794_p6 = por %p119_p3, %p42_p0  ;;  %s730_s21 = smov [#allocation7]  }
   0xc   : > { %s971_s18 = scalar_select %p789_p4, 1, 0 }
   0xd   : > { %s972_s19 = scalar_select %p794_p6, 1, 0 }
   0xe   : > { %p799_p8 = pnand %p476_p5, %p126_p7  ;;  %s138_s22 = sshll.u32 %s730_s21, 4  ;;  %s139_s22 = int_to_ptr.vmem [resolvable:$true] %s138_s22 }
   0xf   : > { %s813_s24 = sadd.s32 1, %s728_s15   ;;  %s29_s25 = sadd.s32 1, %s724_s14 }
  0x10   : > { %s973_s20 = scalar_select %p799_p8, 1, 0 }
  0x11   : > { %p510_p9 = pneg %p799_p8  ;;  %s26_s26 = ssub.s32 %s728_s15, %s813_s24 }
  0x12   : > { %s585_s27 = scalar_lea.vmem %s139_s22, 256  ;;  %p593_p5 = scmp.lt.s32.totalorder %s139_s22, %s139_s22 }
  0x13   : > { %p808_p11 = pnand %p510_p9, %p967_p1  ;;  %p586_p13 = scmp.ne.s32.totalorder %s139_s22, %s585_s27 }
  0x14   : > { %p594_p7 = scmp.lt.s32.totalorder %s585_s27, %s585_s27 }
  0x15   : > { %p576_p12 = pneg %p808_p11 }
  0x16   : > { %p595_p10 = por %p594_p7, %p593_p5 }
  0x17   : > { %p588_p0 = pnand %p586_p13, %p576_p12 }
  0x19   : > { %p589_p3 = pneg %p588_p0 }
  0x1b   : > { %p596_p2 = pnand %p595_p10, %p589_p3 }
  0x1d   : > { %599 = shalt.err (!%p596_p2)
}
  0x1e   : > { %s731_s28 = smov 128   ;;  %s732_s29 = smov 8  }
  0x1f   : > { %513 = dma.hbm_to_vmem [thread:$0]  (!%p808_p11), %s965_s2, 256, %s139_s22, [#allocation6], %s731_s28, %s731_s28, %s732_s29  }
  0x20   : > { %p27_p9 = scmp.eq.s32.totalorder %s26_s26, 0  ;;  %p36_p10 = scmp.ne.s32.totalorder %s724_s14, %s720_s13 }
  0x21   : > { %p37_p2 = scmp.eq.s32.totalorder %s728_s15, 0  ;;  %p526_p12 = scmp.lt.s32.totalorder %s728_s15, 2 }
  0x22   : > { %s830_s5 = scalar_select %p27_p9, %s724_s14, %s29_s25  }
  0x23   : > { %p38_p13 = por %p37_p2, %p36_p10  ;;  %p975_p0 = scmp.eq.s32.totalorder %s780_s16, 1 }
  0x24   : > { %s839_s7 = sand.u32 1, %s724_s14   ;;  %s480_s8 = sshll.u32 %s728_s15, 6 }
  0x25   : > { %p834_p3 = por %p975_p0, %p36_p10  ;;  %s479_s9 = sshll.u32 %s839_s7, 2 }
  0x26   : > { %s846_s17 = scalar_lea.hbm %s963_s0, %s480_s8  ;;  %s156_s21 = scalar_lea.vmem [#allocation2], %s479_s9 }
  0x27   : > { %s976_s6 = scalar_select %p834_p3, 1, 0 }
  0x28   : > { %s163_s22 = sshll.u32 %s156_s21, 4  ;;  %p848_p11 = pnand %p526_p12, %p38_p13  ;;  %s164_s22 = int_to_ptr.vmem [resolvable:$true] %s163_s22 }
  0x29   : > { %s170_s25 = sand.u32 1, %s728_s15   ;;  %s153_s26 = scalar_lea.sflag [#allocation3], %s839_s7 }
  0x2a   : > { %s600_s27 = scalar_lea.hbm %s846_s17, 64  ;;  %p602_p7 = pneg %p848_p11 }
  0x2b   : > { %p601_p5 = scmp.ne.s32.totalorder %s846_s17, %s600_s27  ;;  %s605_s30 = scalar_lea.hbm %s963_s0, 128 }
  0x2c   : > { %p606_p2 = scmp.lt.s32.totalorder %s846_s17, %s963_s0  ;;  %p607_p12 = scmp.lt.s32.totalorder %s605_s30, %s600_s27 }
  0x2d   : > { %p603_p9 = pnand %p602_p7, %p601_p5 }
  0x2e   : > { %p608_p13 = por %p607_p12, %p606_p2 }
  0x2f   : > { %p604_p10 = pneg %p603_p9 }
  0x31   : > { %p609_p0 = pnand %p608_p13, %p604_p10 }
  0x33   : > { %612 = shalt.err (!%p609_p0)
}
  0x34   : > { %s613_s9 = scalar_lea.vmem %s164_s22, 64  ;;  %s733_s10 = smov [#allocation2]  }
  0x35   : > { %p614_p1 = scmp.ne.s32.totalorder %s164_s22, %s613_s9  ;;  %s618_s11 = sshll.u32 %s733_s10, 4  ;;  %s619_s11 = int_to_ptr.vmem [resolvable:$false] %s618_s11 }
  0x36   : > { %s620_s21 = scalar_lea.vmem %s619_s11, 128  ;;  %p621_p9 = scmp.lt.s32.totalorder %s164_s22, %s619_s11 }
  0x37   : > { %p616_p6 = pnand %p614_p1, %p602_p7  ;;  %p622_p3 = scmp.lt.s32.totalorder %s620_s21, %s613_s9 }
  0x39   : > { %p617_p5 = pneg %p616_p6  ;;  %p623_p4 = por %p622_p3, %p621_p9 }
  0x3b   : > { %p624_p8 = pnand %p623_p4, %p617_p5 }
  0x3d   : > { %627 = shalt.err (!%p624_p8)
}
  0x3e   : > { %517 = dma.hbm_to_vmem [thread:$0]  (!%p848_p11), %s846_s17, 64, %s164_s22, %s153_s26  }
  0x3f   : > { %s481_s27 = sshll.u32 %s728_s15, 4  ;;  %s173_s4 = scalar_lea.vmem [#allocation5], %s839_s7 }
  0x40   : > { %s878_s30 = scalar_lea.hbm %s964_s1, %s481_s27  ;;  %s180_s8 = sshll.u32 %s173_s4, 4  ;;  %s181_s8 = int_to_ptr.vmem [resolvable:$true] %s180_s8 }
  0x41   : > { %s171_s9 = scalar_lea.sflag [#allocation6], %s170_s25  ;;  %s628_s10 = scalar_lea.hbm %s878_s30, 16 }
  0x42   : > { %p629_p1 = scmp.ne.s32.totalorder %s878_s30, %s628_s10  ;;  %s633_s26 = scalar_lea.hbm %s964_s1, 32 }
  0x43   : > { %p634_p8 = scmp.lt.s32.totalorder %s878_s30, %s964_s1  ;;  %p635_p3 = scmp.lt.s32.totalorder %s633_s26, %s628_s10 }
  0x44   : > { %p631_p4 = pnand %p629_p1, %p602_p7 }
  0x45   : > { %p636_p10 = por %p635_p3, %p634_p8 }
  0x46   : > { %p632_p6 = pneg %p631_p4 }
  0x48   : > { %p637_p2 = pnand %p636_p10, %p632_p6 }
  0x4a   : > { %640 = shalt.err (!%p637_p2)
}
  0x4b   : > { %s641_s7 = scalar_lea.vmem %s181_s8, 16  ;;  %s734_s25 = smov [#allocation5]  }
  0x4c   : > { %p642_p12 = scmp.ne.s32.totalorder %s181_s8, %s641_s7  ;;  %s646_s27 = sshll.u32 %s734_s25, 4  ;;  %s647_s27 = int_to_ptr.vmem [resolvable:$false] %s646_s27 }
  0x4d   : > { %s648_s28 = scalar_lea.vmem %s647_s27, 32  ;;  %p649_p5 = scmp.lt.s32.totalorder %s181_s8, %s647_s27 }
  0x4e   : > { %p644_p13 = pnand %p642_p12, %p602_p7  ;;  %p650_p9 = scmp.lt.s32.totalorder %s648_s28, %s641_s7 }
  0x50   : > { %p645_p0 = pneg %p644_p13  ;;  %p651_p1 = por %p650_p9, %p649_p5 }
  0x52   : > { %p652_p4 = pnand %p651_p1, %p645_p0 }
  0x54   : > { %655 = shalt.err (!%p652_p4)
}
  0x55   : > { %520 = dma.hbm_to_vmem [thread:$0]  (!%p848_p11), %s878_s30, 16, %s181_s8, %s171_s9  }
  0x56   : > { %p978_p6 = scmp.ne.s32.totalorder %s973_s20, 0 }
  0x57   : > { %s904_s29 = sand.u32 (!%p978_p6), 1, %s720_s13   ;;  %p979_p7 = scmp.ne.s32.totalorder (!%p978_p6), %s971_s18, 0 }
  0x58   : > { %189 = sbr.rel (%p978_p6) target bundleno = 829 (0x33d), region = 32  ;;  %s483_s4 = sshll.u32 (!%p978_p6), %s904_s29, 2 }
  0x59   : > { %s192_s10 = scalar_lea.sflag (!%p978_p6), [#allocation3], %s904_s29  ;;  %s195_s17 = scalar_lea.vmem (!%p978_p6), [#allocation2], %s483_s4 }
  0x5d   : > { %699 = dma.done.wait (%p979_p7), %s192_s10, 64  }
  0x5e   : > { %701 = vsyncadd (%p979_p7), %s192_s10, 4294967232  ;;  %s200_s23 = sand.u32 1, %s780_s16   ;;  %s203_s30 = scalar_lea.vmem [#allocation5], %s904_s29 }
  0x5f   : > { %s201_s20 = scalar_lea.sflag [#allocation6], %s200_s23 }
  0x60   : > { %703 = dma.done.wait (%p979_p7), %s201_s20, 16  }
  0x61   : > { %705 = vsyncadd (%p979_p7), %s201_s20, 4294967280  ;;  %p980_p11 = scmp.eq.s32.totalorder %s780_s16, 0 }
  0x63   : > { %707 = dma.done.wait (%p980_p11), [#allocation6], 256   ;;  %p981_p8 = pmov %p980_p11 }
  0x64   : > { %v735_v0 = vmov 0   ;;  %v567_v1 = vld [vmem:[#allocation7 + $0x4] ss:$8 sps:$4 sm:$0xff]   ;;  %v569_v2 = vld [vmem:[#allocation7] ss:$8 sps:$4 sm:$0xff]   ;;  %vm248_vm0 = vcmask 130048   ;;  %v358_v25 = vlaneseq }
  0x65   : > { %709 = vsyncadd (%p981_p8), [#allocation6], 4294967040  ;;  %284 = vmatprep.mubr.bf16.mxu0 %v735_v0  ;;  %266 = vmatprep.subr.bf16.mxu0 %v567_v1  ;;  %v234_v3 = vld [vmem:[%s195_s17] sm:$0xf]  ;;  %v736_v4 = vmov 0.0   ;;  %vm737_vm1 = vmmov 0  }
  0x66   : > { %267 = vmatpush1.bf16.msra.mxu0 %v569_v2  ;;  %494 = vmatprep.subr.bf16.mxu1 %v736_v4  ;;  %vm335_vm2 = vcmask 64512   ;;  %v488_v19 = vld [vmem:[%s203_s30] ss:$0 sm:$0xff]  ;;  %v359_v26 = vand.u32 127, %v358_v25  ;;  %v361_v27 = vshrl.u32 %v358_v25, 7  ;;  %s489_s18 = sshll.u32 %s780_s16, 4 }
  0x67   : > { %496 = vmatprep.mubr.msk.bf16.mxu1 %vm737_vm1, %v736_v4  ;;  %s232_s8 = scalar_lea.vmem [#allocation8], %s904_s29  ;;  %vm365_vm3 = vcmask 57344   ;;  %s378_s11 = scalar_lea.hbm %s966_s3, %s489_s18 }
  0x68   : > { %v362_v28 = vsub.s32 %v359_v26, %v361_v27  ;;  %s380_s9 = sshll.u32 %s232_s8, 4  ;;  %s368_s21 = scalar_lea.sflag [#allocation4], %s904_s29  ;;  %s381_s9 = int_to_ptr.vmem [resolvable:$true] %s380_s9 }
  0x69   : > { %487 = vmatmul.mubr.msk.bf16.vlgmr.msra.gmra.mxu0 %vm248_vm0, %v234_v3  ;;  %s656_s7 = scalar_lea.vmem %s381_s9, 16  ;;  %p982_p10 = scmp.ne.s32.totalorder %s976_s6, 0 }
  0x6a   : > { %p657_p3 = scmp.ne.s32.totalorder %s381_s9, %s656_s7  ;;  %s738_s25 = smov [#allocation8]  }
  0x6b   : > { %s660_s27 = sshll.u32 %s738_s25, 4  ;;  %s661_s27 = int_to_ptr.vmem [resolvable:$false] %s660_s27 }
  0x6c   : > { %p658_p2 = pnand %p657_p3, %p982_p10  ;;  %s662_s16 = scalar_lea.vmem %s661_s27, 32 }
  0x6d   : > { %p663_p13 = scmp.lt.s32.totalorder %s381_s9, %s661_s27  ;;  %p664_p0 = scmp.lt.s32.totalorder %s662_s16, %s656_s7 }
  0x6e   : > { %p659_p12 = pneg %p658_p2 }
  0x6f   : > { %p665_p5 = por %p664_p0, %p663_p13 }
  0x71   : > { %p666_p9 = pnand %p665_p5, %p659_p12 }
 0x129   : > { %v286_v5 = vpop.f32.mrf.mxu0 }
 0x12a   : > { %v293_v10 = vpack.c.bf16 %v286_v5, %v286_v5 }
 0x12b   : > { %v288_v6 = vpop.f32.mrf.mxu0 }
 0x12c   : > { %v294_v7 = vpack.c.bf16 %v288_v6, %v288_v6 }
 0x12d   : > { %v290_v8 = vpop.f32.mrf.mxu0 }
 0x12e   : > { %495 = vmatpush3.bf16.xpose.msra.mxu1 %v294_v7 }
 0x12f   : > { %v291_v9 = vpop.f32.mrf.mxu0 }
 0x135   : > { %497 = vmatmul.mubr.bf16.vlgmr.msra.gmra.mxu1 %v293_v10 }
 0x1f5   : > { %v329_v11 = vpop.f32.mrf.mxu1 }
 0x1f6   : > { %v336_v12 = vsel %vm335_vm2, %v329_v11, -inf }
 0x1f7   : > { %337 = vmax.xlane.f32.xlu0 %v336_v12  ;;  %v498_v13 = vpop.f32.mrf.mxu1 }
 0x1f9   : > { %v332_v14 = vpop.f32.mrf.mxu1 }
 0x1fb   : > { %v499_v15 = vpop.f32.mrf.mxu1 }
 0x280   : > { %v338_v16 = vpop.xlane.xlu0 %337 }
 0x281   : > { %v339_v17 = vsub.f32 %v329_v11, %v338_v16 }
 0x283   : > { %v340_v18 = vmul.f32 1.442695, %v339_v17 }
 0x285   : > { %570 = vpow2.f32 %v340_v18 }
 0x292   : > { %v571_v20 = vpop.eup %570 }
 0x293   : > { %v342_v21 = vsel %vm335_vm2, %v571_v20, 0.0  ;;  %v351_v22 = vmul.f32 %v571_v20, %v488_v19 }
 0x294   : > { %343 = vadd.xlane.f32.xlu0 %v342_v21 }
 0x295   : > { %v352_v23 = vsel %vm335_vm2, %v351_v22, 0.0 }
 0x296   : > { %353 = vadd.xlane.f32.xlu1 %v352_v23 }
 0x31d   : > { %v344_v24 = vpop.xlane.xlu0 %343 }
 0x31e   : > { %572 = vrcp.f32 %v344_v24 }
 0x31f   : > { %v354_v30 = vpop.xlane.xlu1 %353 }
 0x32b   : > { %v573_v29 = vpop.eup %572 }
 0x32c   : > { %v356_v31 = vmul.f32 %v573_v29, %v354_v30 }
 0x32e   : > { %v363_v32 = vrot.slane %v356_v31, %v362_v28 }
 0x330   : > { %366 = vst.msk [vmem:[%s232_s8] sm:$0x1] %vm365_vm3, %v363_v32 }
 0x331   : > { %669 = shalt.err (!%p666_p9)
}
 0x332   : > { %s670_s28 = scalar_lea.hbm %s378_s11, 16  ;;  %s674_s10 = scalar_lea.hbm %s966_s3, 32 }
 0x333   : > { %p671_p1 = scmp.ne.s32.totalorder %s378_s11, %s670_s28  ;;  %p675_p7 = scmp.lt.s32.totalorder %s378_s11, %s966_s3 }
 0x334   : > { %p676_p11 = scmp.lt.s32.totalorder %s674_s10, %s670_s28 }
 0x335   : > { %p672_p4 = pnand %p671_p1, %p982_p10 }
 0x336   : > { %p677_p8 = por %p676_p11, %p675_p7 }
 0x337   : > { %p673_p6 = pneg %p672_p4 }
 0x339   : > { %p678_p3 = pnand %p677_p8, %p673_p6 }
 0x33b   : > { %681 = shalt.err (!%p678_p3)
}
 0x33c   : > { %508 = dma.vmem_to_hbm [thread:$0]  (%p982_p10), %s381_s9, 16, %s378_s11, %s368_s21  }
 0x33d PF: > { %s392_s20 = sand.u32 1, %s716_s12   ;;  %p983_p2 = scmp.ne.s32.totalorder %s972_s19, 0 }
 0x33e   : > { %p984_p12 = scmp.ge.s32.totalorder %s728_s15, 2  ;;  %s393_s30 = scalar_lea.sflag [#allocation4], %s392_s20 }
 0x340   : > { %p522_p13 = pnand %p984_p12, %p983_p2 }
 0x342   : > { %p523_p0 = pneg %p522_p13 }
 0x344   : > { %711 = dma.done.wait (%p523_p0), %s393_s30, 16  }
 0x345   : > { %713 = vsyncadd (%p523_p0), %s393_s30, 4294967280  ;;  %p19_p5 = scmp.ge.s32.totalorder %s813_s24, 4   ;;  %s985_s12 = smov %s720_s13 }
 0x346   : > { %s986_s13 = smov %s724_s14  ;;  %s987_s14 = smov %s830_s5 }
 0x347   : > { %s988_s15 = smov %s813_s24  ;;  %21 = sbr.rel (!%p19_p5) target bundleno = 7 (0x7), region = 94 }
 0x34c   :  { %397 = vsyncpa [#allocation3], 1 }
 0x34d   :  { %399 = vsyncpa [#allocation3 + $0x1], 1 }
 0x34e   :  { %400 = vsyncpa [#allocation6], 1 }
 0x34f   :  { %402 = vsyncpa [#allocation6 + $0x1], 1 }
 0x350   :  { %403 = vsyncpa [#allocation4], 1 }
 0x351   :  { %405 = vsyncpa [#allocation4 + $0x1], 1 }

</bundles_post_ra>
